<compile_context>
chip_gen: v7x
topology: tpu7x:2x2x1
jax: 0.10.0
libtpu: 0.0.40
codegen_flags: <defaults>
</compile_context>

<pallas_src>
import jax
import jax.numpy as jnp
from jax.experimental import pallas as pl
from jax.experimental.pallas import tpu as pltpu


def policy_kernel(x_ref, w1_ref, b1_ref, w2_ref, b2_ref, out_ref):
    # fc1 + ReLU  (MXU matmul, f32 accumulation; bias rides in VALU slack)
    x = x_ref[...]
    h = jnp.dot(x, w1_ref[...], preferred_element_type=jnp.float32) + b1_ref[...]
    h = jnp.maximum(h, 0.0)

    # fc2
    logits = jnp.dot(h, w2_ref[...], preferred_element_type=jnp.float32) + b2_ref[...]

    # softmax along dim=1 (last axis), numerically stable.
    # Exact division so each row sums to 1 to f32 rounding (the approx EUP
    # reciprocal previously broke the sum-to-one property).
    m = jnp.max(logits, axis=-1, keepdims=True)
    e = jnp.exp(logits - m)
    denom = jnp.sum(e, axis=-1, keepdims=True)
    out_ref[...] = (e / denom).astype(out_ref.dtype)


def _policy_forward_small(x, w1, b1, w2, b2):
    """Grid-free path: whole problem resident in VMEM, single kernel body."""
    B, _ = x.shape
    A = w2.shape[1]
    vmem = lambda: pl.BlockSpec(memory_space=pltpu.MemorySpace.VMEM)
    return pl.pallas_call(
        policy_kernel,
        out_shape=jax.ShapeDtypeStruct((B, A), jnp.float32),
        in_specs=[vmem(), vmem(), vmem(), vmem(), vmem()],
        out_specs=vmem(),
    )(x, w1, b1, w2, b2)


def _policy_forward_tiled(x, w1, b1, w2, b2, tb):
    """Batch-tiled path for large B: x/out blocked on dim 0, weights resident.

    Batch axis is marked "parallel" so v7x's two TensorCores split it.
    """
    B, S = x.shape
    H = w1.shape[1]
    A = w2.shape[1]

    nb = pl.cdiv(B, tb)
    Bp = nb * tb
    if Bp != B:
        # Pad the batch so every grid block is full; padded rows are sliced off.
        x = jnp.pad(x, ((0, Bp - B), (0, 0)))

    out = pl.pallas_call(
        policy_kernel,
        out_shape=jax.ShapeDtypeStruct((Bp, A), jnp.float32),
        grid_spec=pltpu.PrefetchScalarGridSpec(
            num_scalar_prefetch=0,
            grid=(nb,),
            in_specs=[
                pl.BlockSpec((tb, S), lambda i: (i, 0)),   # x: batch-tiled
                pl.BlockSpec((S, H), lambda i: (0, 0)),    # w1: resident
                pl.BlockSpec((1, H), lambda i: (0, 0)),    # b1: resident
                pl.BlockSpec((H, A), lambda i: (0, 0)),    # w2: resident
                pl.BlockSpec((1, A), lambda i: (0, 0)),    # b2: resident
            ],
            out_specs=pl.BlockSpec((tb, A), lambda i: (i, 0)),
        ),
        compiler_params=pltpu.CompilerParams(
            dimension_semantics=("parallel",),  # megacore split on v7x
        ),
    )(x, w1, b1, w2, b2)

    return out[:B] if Bp != B else out


def policy_forward(x, w1, b1, w2, b2, *, batch_tile=1024):
    """x: (B, S) f32; w1: (S, H); b1: (1, H); w2: (H, A); b2: (1, A) -> (B, A)."""
    B = x.shape[0]
    if batch_tile is None or B <= batch_tile:
        return _policy_forward_small(x, w1, b1, w2, b2)
    return _policy_forward_tiled(x, w1, b1, w2, b2, batch_tile)


if __name__ == "__main__":
    # CliffWalking-style sizes: s_size=48 (one-hot states), a_size=4, h_size=32
    S, H, A = 48, 32, 4

    key = jax.random.PRNGKey(0)
    kx, kw1, kb1, kw2, kb2, kx2 = jax.random.split(key, 6)

    # Deterministic synthetic parameters (PyTorch-Linear-like uniform init ranges).
    bound1 = 1.0 / (S ** 0.5)
    bound2 = 1.0 / (H ** 0.5)
    w1 = jax.random.uniform(kw1, (S, H), jnp.float32, -bound1, bound1)
    b1 = jax.random.uniform(kb1, (1, H), jnp.float32, -bound1, bound1)
    w2 = jax.random.uniform(kw2, (H, A), jnp.float32, -bound2, bound2)
    b2 = jax.random.uniform(kb2, (1, A), jnp.float32, -bound2, bound2)

    def ref_forward(xv):
        return jax.nn.softmax(jnp.maximum(xv @ w1 + b1, 0.0) @ w2 + b2, axis=1)

    # --- small batch: grid-free, overhead-minimized path -------------------
    B = 8
    x = jax.random.normal(kx, (B, S), jnp.float32)
    probs = jax.block_until_ready(policy_forward(x, w1, b1, w2, b2))
    assert probs.shape == (B, A)
    assert jnp.allclose(probs, ref_forward(x), atol=1e-3, rtol=1e-3)
    # exact division -> rows sum to 1 within f32 rounding
    assert jnp.allclose(jnp.sum(probs, axis=1), 1.0, atol=1e-4)

    # --- large batch: batch-tiled path (weights VMEM-resident across steps) -
    B2 = 1000
    x2 = jax.random.normal(kx2, (B2, S), jnp.float32)
    probs2 = jax.block_until_ready(
        policy_forward(x2, w1, b1, w2, b2, batch_tile=256)
    )
    assert probs2.shape == (B2, A)
    assert jnp.allclose(probs2, ref_forward(x2), atol=1e-3, rtol=1e-3)
    assert jnp.allclose(jnp.sum(probs2, axis=1), 1.0, atol=1e-4)

    print("KERNEL_OK")
</pallas_src>

<mosaic_0001>
module attributes {stable_mosaic.version = 11 : i64} {
  func.func @policy_kernel(%arg0: memref<8x48xf32, #tpu.memory_space<vmem>>, %arg1: memref<48x32xf32, #tpu.memory_space<vmem>>, %arg2: memref<1x32xf32, #tpu.memory_space<vmem>>, %arg3: memref<32x4xf32, #tpu.memory_space<vmem>>, %arg4: memref<1x4xf32, #tpu.memory_space<vmem>>, %arg5: memref<8x4xf32, #tpu.memory_space<vmem>>) attributes {dimension_semantics = [], scalar_prefetch = 0 : i64, scratch_operands = 0 : i64, tpu.core_type = #tpu.core_type<tc>} {
    %c0 = arith.constant 0 : index
    %c0_0 = arith.constant 0 : index
    %0 = vector.load %arg0[%c0, %c0_0] : memref<8x48xf32, #tpu.memory_space<vmem>>, vector<8x48xf32>
    %c0_1 = arith.constant 0 : index
    %c0_2 = arith.constant 0 : index
    %1 = vector.load %arg1[%c0_1, %c0_2] : memref<48x32xf32, #tpu.memory_space<vmem>>, vector<48x32xf32>
    %cst = arith.constant dense<0.000000e+00> : vector<8x32xf32>
    %2 = tpu.matmul %0, %1, %cst {dimension_numbers = #tpu.dot_dimension_numbers<[1], [0], [0], [1], [0, 0, 1, 1], [], []>} : vector<8x48xf32>, vector<48x32xf32>, vector<8x32xf32> -> vector<8x32xf32>
    %c0_3 = arith.constant 0 : index
    %c0_4 = arith.constant 0 : index
    %3 = vector.load %arg2[%c0_3, %c0_4] : memref<1x32xf32, #tpu.memory_space<vmem>>, vector<1x32xf32>
    %4 = vector.broadcast %3 : vector<1x32xf32> to vector<8x32xf32>
    %5 = arith.addf %2, %4 : vector<8x32xf32>
    %cst_5 = arith.constant 0.000000e+00 : f32
    %6 = vector.broadcast %cst_5 : f32 to vector<8x32xf32>
    %7 = arith.maximumf %5, %6 : vector<8x32xf32>
    %c0_6 = arith.constant 0 : index
    %c0_7 = arith.constant 0 : index
    %8 = vector.load %arg3[%c0_6, %c0_7] : memref<32x4xf32, #tpu.memory_space<vmem>>, vector<32x4xf32>
    %cst_8 = arith.constant dense<0.000000e+00> : vector<8x4xf32>
    %9 = tpu.matmul %7, %8, %cst_8 {dimension_numbers = #tpu.dot_dimension_numbers<[1], [0], [0], [1], [0, 0, 1, 1], [], []>} : vector<8x32xf32>, vector<32x4xf32>, vector<8x4xf32> -> vector<8x4xf32>
    %c0_9 = arith.constant 0 : index
    %c0_10 = arith.constant 0 : index
    %10 = vector.load %arg4[%c0_9, %c0_10] : memref<1x4xf32, #tpu.memory_space<vmem>>, vector<1x4xf32>
    %11 = vector.broadcast %10 : vector<1x4xf32> to vector<8x4xf32>
    %12 = arith.addf %9, %11 : vector<8x4xf32>
    %cst_11 = arith.constant dense<0xFF800000> : vector<8xf32>
    %13 = vector.multi_reduction <maximumf>, %12, %cst_11 [1] : vector<8x4xf32> to vector<8xf32>
    %14 = vector.shape_cast %13 : vector<8xf32> to vector<8x1xf32>
    %15 = vector.broadcast %14 : vector<8x1xf32> to vector<8x4xf32>
    %16 = arith.subf %12, %15 : vector<8x4xf32>
    %17 = math.exp %16 : vector<8x4xf32>
    %cst_12 = arith.constant dense<0.000000e+00> : vector<8xf32>
    %18 = vector.multi_reduction <add>, %17, %cst_12 [1] : vector<8x4xf32> to vector<8xf32>
    %19 = vector.shape_cast %18 : vector<8xf32> to vector<8x1xf32>
    %20 = vector.broadcast %19 : vector<8x1xf32> to vector<8x4xf32>
    %21 = arith.divf %17, %20 : vector<8x4xf32>
    %c0_13 = arith.constant 0 : index
    %c0_14 = arith.constant 0 : index
    %22 = vector.load %arg5[%c0_13, %c0_14] : memref<8x4xf32, #tpu.memory_space<vmem>>, vector<8x4xf32>
    tpu.vector_store %arg5[%c0_13, %c0_14], %21 {strides = array<i32>} : memref<8x4xf32, #tpu.memory_space<vmem>>, vector<8x4xf32>,
    return
  }
}

</mosaic_0001>

<bundles_post_ra>
// kernel: tpu_custom_call.1
= control target key start
LH: loop header
LB: loop body
LE: loop exit
PB: predicated region body
PF: predicated region fallthrough
CT: control target
= control target key end

     0   :  { %v275_v0 = vmov 0.0|0.0   ;;  %vm276_vm0 = vmmov 0   ;;  %v277_v4 = vmov 0.0   ;;  %vm34_vm1 = vcmask 392192   ;;  %s353_s1 = inlined_call_operand.vmem [shape: f32[48,32], index: 1, kind: input, shape index: {}]   ;;  %s354_s3 = inlined_call_operand.vmem [shape: f32[32,4], index: 3, kind: input, shape index: {}]   ;;  %s355_s0 = inlined_call_operand.vmem [shape: f32[8,48], index: 0, kind: input, shape index: {}]   ;;  %s356_s2 = inlined_call_operand.vmem [shape: f32[1,32], index: 2, kind: input, shape index: {}]   ;;  %s357_s4 = inlined_call_operand.vmem [shape: f32[1,4], index: 4, kind: input, shape index: {}]   ;;  %s358_s5 = inlined_call_operand.vmem [shape: f32[8,4], index: 5, kind: output, shape index: {}]  }
   0x1   :  { %253 = vmatprep.subr.bf16.mxu0 %v275_v0  ;;  %v21_v1 = vld [vmem:[%s353_s1] sm:$0xff]  ;;  %v22_v2 = vld [vmem:[%s353_s1 + $0x8] sm:$0xff]  ;;  %v23_v3 = vld [vmem:[%s353_s1 + $0x10] sm:$0xff]  ;;  %239 = vmatprep.mubr.msk.f32.mxu0 %vm276_vm0, %v277_v4  ;;  %vm120_vm2 = vcmask 261120   ;;  %vm194_vm3 = vcmask 31744  }
   0x2   :  { %v254_v5 = vpack.c.bf16 %v22_v2, %v21_v1  ;;  %v24_v6 = vld [vmem:[%s353_s1 + $0x18] sm:$0xff]  ;;  %262 = vmatprep.subr.bf16.mxu1 %v275_v0  ;;  %250 = vmatprep.mubr.msk.f32.mxu1 %vm276_vm0, %v277_v4  ;;  %v109_v7 = vld [vmem:[%s354_s3] sm:$0xff]  ;;  %v110_v8 = vld [vmem:[%s354_s3 + $0x8] sm:$0xff] }
   0x3   :  { %v257_v9 = vpack.c.bf16 %v24_v6, %v23_v3  ;;  %v263_v10 = vpack.c.bf16 %v110_v8, %v109_v7  ;;  %v25_v11 = vld [vmem:[%s353_s1 + $0x20] sm:$0xff]  ;;  %v26_v12 = vld [vmem:[%s353_s1 + $0x28] sm:$0xff]  ;;  %v111_v15 = vld [vmem:[%s354_s3 + $0x10] sm:$0xff] }
   0x4   :  { %255 = vmatpush3.bf16.msra.mxu0 %v254_v5  ;;  %v260_v13 = vpack.c.bf16 %v26_v12, %v25_v11  ;;  %v20_v14 = vld [vmem:[%s355_s0] sm:$0xff]  ;;  %v112_v16 = vld [vmem:[%s354_s3 + $0x18] sm:$0xff] }
   0x5   :  { %256 = vmatprep.subr.bf16.mxu0 %v275_v0  ;;  %264 = vmatpush3.bf16.msra.mxu1 %v263_v10  ;;  %v266_v17 = vpack.c.bf16 %v112_v16, %v111_v15  ;;  %v211_v18 = vld [vmem:[%s356_s2] ss:$0 sm:$0xff] }
   0x6   :  { %265 = vmatprep.subr.bf16.mxu1 %v275_v0  ;;  %v213_v23 = vld [vmem:[%s357_s4] ss:$0 sm:$0xff] }
   0x8   :  { %258 = vmatpush3.bf16.msra.mxu0 %v257_v9 }
   0x9   :  { %259 = vmatprep.subr.bf16.mxu0 %v275_v0  ;;  %267 = vmatpush3.bf16.msra.mxu1 %v266_v17 }
   0xc   :  { %261 = vmatpush3.bf16.msra.mxu0 %v260_v13 }
   0xf   :  { %240 = vmatmul.mubr.msk.f32.vlgmr.msra.gmra.mrb[0].mxu0 %vm34_vm1, %v20_v14 }
  0xe2   :  { %v104_v19 = vpop.f32.mrb[0].mxu0 }
  0xe3   :  { %v105_v20 = vadd.f32 %v211_v18, %v104_v19  ;;  %v241_v21 = vpop.f32.mrb[1].mxu0 }
  0xe5   :  { %v108_v22 = vmax.f32 %v105_v20, 0.0 }
  0xe7   :  { %251 = vmatmul.mubr.msk.f32.vlgmr.msra.gmra.mrb[0].mxu1 %vm120_vm2, %v108_v22 }
 0x1ba   :  { %v190_v24 = vpop.f32.mrb[0].mxu1 }
 0x1bb   :  { %v191_v25 = vadd.f32 %v213_v23, %v190_v24  ;;  %v252_v26 = vpop.f32.mrb[1].mxu1 }
 0x1bd   :  { %v195_v27 = vsel %vm194_vm3, %v191_v25, -inf }
 0x1be   :  { %196 = vmax.xlane.f32.xlu0 %v195_v27 }
 0x24b   :  { %v197_v28 = vpop.xlane.xlu0 %196 }
 0x24c   :  { %v198_v29 = vsub.f32 %v191_v25, %v197_v28 }
 0x24e   :  { %v199_v30 = vmul.f32 1.442695, %v198_v29 }
 0x250   :  { %271 = vpow2.f32 %v199_v30 }
 0x25a   :  { %v272_v31 = vpop.eup %271 }
 0x25b   :  { %v201_v32 = vsel %vm194_vm3, %v272_v31, 0.0 }
 0x25c   :  { %202 = vadd.xlane.f32.xlu0 %v201_v32 }
 0x2e9   :  { %v203_v33 = vpop.xlane.xlu0 %202 }
 0x2ea   :  { %273 = vrcp.f32 %v203_v33 }
 0x2f4   :  { %v274_v34 = vpop.eup %273 }
 0x2f5   :  { %v205_v35 = vmul.f32 %v274_v34, %v272_v31 }
 0x2f7   :  { %206 = vst.msk [vmem:[%s358_s5] sm:$0xff] %vm194_vm3, %v205_v35 }

</bundles_post_ra>
